<compile_context>
chip_gen: v6e
topology: v6e:2x2x1
jax: 0.10.0
libtpu: 0.0.40
codegen_flags: <defaults>
</compile_context>

<pallas_src>
import jax
import jax.numpy as jnp
from jax.experimental import pallas as pl
from jax.experimental.pallas import tpu as pltpu


def _round_up(x, m):
    return ((x + m - 1) // m) * m


def _choose_n_tile(n, num_players, cap=512):
    """Lane-dense N tile: multiple of 128, <= cap, dividing the padded N.

    For a single player, cap the tile at n_padded//2 so there are >= 2
    parallel grid blocks (keeps both v7x TensorCores busy; no-op on v5e/v6e).
    """
    n_padded = _round_up(n, 128)
    cap_eff = cap
    if num_players == 1 and n_padded >= 256:
        cap_eff = min(cap_eff, n_padded // 2)
    t = max(128, (cap_eff // 128) * 128)
    while t > 128:
        if n_padded % t == 0:
            break
        t -= 128
    return t, n_padded


def _make_uv_sh_kernel(*, H, W, W_pad, C_pad, R, n_blocks, mxu_dtype,
                       sh_scale_channels, sh_scale):
    """Build the per-tile kernel.

    Refs (scalar-prefetch first):
      slab_lo_ref / slab_hi_ref : SMEM int32 [P*n_blocks]
      uv_ref  : [2, n_tile] f32            (row 0 = x, row 1 = y)
      fm_ref  : [n_slabs, R*C_pad, W_pad]  (full per-player map, resident)
      out_ref : [C_pad, n_tile] f32
    """

    def kernel(slab_lo_ref, slab_hi_ref, uv_ref, fm_ref, out_ref):
        p = pl.program_id(0)
        nb = pl.program_id(1)
        tile = p * n_blocks + nb
        slab_lo = slab_lo_ref[tile]
        slab_hi = slab_hi_ref[tile]

        n_tile = out_ref.shape[1]

        uv = uv_ref[...]
        # align_corners=False unnormalization (PyTorch grid_sample).
        fx = ((uv[0:1, :] + 1.0) * W - 1.0) * 0.5          # [1, n_tile]
        fy = ((uv[1:2, :] + 1.0) * H - 1.0) * 0.5          # [1, n_tile]

        # Column ("x") hat weights over the padded width, built ONCE per tile.
        # Out-of-range / padded columns hit zero-padded fm -> exact
        # padding_mode='zeros' behaviour.
        w_idx = jax.lax.broadcasted_iota(jnp.int32, (W_pad, n_tile), 0)
        wx = jnp.maximum(0.0, 1.0 - jnp.abs(w_idx.astype(jnp.float32) - fx))
        wx_mx = wx.astype(mxu_dtype)                       # [W_pad, n_tile]

        out_ref[...] = jnp.zeros(out_ref.shape, out_ref.dtype)

        def slab_body(s, carry):
            # One row slab: image rows [s*R, s*R + R).
            fm_slab = fm_ref[s]                            # [R*C_pad, W_pad]
            g = jnp.dot(fm_slab, wx_mx,
                        preferred_element_type=jnp.float32)  # [R*C_pad, n_tile]
            r0f = (s * R).astype(jnp.float32)
            acc = None
            for r in range(R):                             # static unroll
                # Row ("y") hat weight for image row s*R + r  -> [1, n_tile].
                wy_r = jnp.maximum(0.0, 1.0 - jnp.abs((r0f + r) - fy))
                part = g[r * C_pad:(r + 1) * C_pad, :] * wy_r
                acc = part if acc is None else acc + part
            out_ref[...] += acc                            # single RMW / slab
            return carry

        jax.lax.fori_loop(slab_lo, slab_hi + 1, slab_body, 0)

        # Finalize: fused SHEncoder scale (shs[:, 0, :] *= 20 -> channels 0..2).
        ch = jax.lax.broadcasted_iota(jnp.int32, (C_pad, 1), 0)
        scale = jnp.where(ch < sh_scale_channels,
                          jnp.float32(sh_scale), jnp.float32(1.0))
        out_ref[...] = out_ref[...] * scale

    return kernel


def uv_grid_sample_sh_pallas(uvs, feature_map, *, sh_scale_channels=3,
                             sh_scale=20.0, fm_dtype=jnp.bfloat16):
    """Fused grid_sample(bilinear, zeros, align_corners=False) + SH scale.

    uvs:         [P, N, 2] in [-1, 1] (x, y), like F.grid_sample's grid.
    feature_map: [P, C, H, W].
    Returns [P, N, C]; channels [0:sh_scale_channels] already multiplied by
    sh_scale (SHEncoder's `shs[:,0,:] *= 20` fused into the kernel).
    """
    uvs = uvs.astype(jnp.float32)
    P, N, two = uvs.shape
    assert two == 2, "uv coordinates must have last dim 2"
    Pf, C, H, W = feature_map.shape
    assert Pf == P

    # ---- static tiling decisions -------------------------------------------
    C_pad = _round_up(C, 16)          # bf16 sublane-tile aligned channel dim
    W_pad = _round_up(W, 128)         # lane-dense contraction dim
    R = max(1, 128 // C_pad)          # rows per slab -> matmul M = R*C_pad
    H_pad = _round_up(H, R)
    n_slabs = H_pad // R
    n_tile, n_padded = _choose_n_tile(N, P)
    n_blocks = n_padded // n_tile

    # ---- feature map: [P,C,H,W] -> [P, n_slabs, R*C_pad, W_pad] (zero pad) --
    fm = jnp.transpose(feature_map.astype(jnp.float32), (0, 2, 1, 3))  # [P,H,C,W]
    fm = jnp.pad(fm, ((0, 0), (0, H_pad - H), (0, C_pad - C), (0, W_pad - W)))
    fm = fm.astype(fm_dtype).reshape(P, n_slabs, R * C_pad, W_pad)

    # ---- sort points by image row so each N tile touches few row slabs ------
    fy_all = ((uvs[..., 1] + 1.0) * H - 1.0) * 0.5                     # [P, N]
    order = jnp.argsort(fy_all, axis=1)                                # [P, N]
    inv_order = jnp.argsort(order, axis=1)                             # [P, N]
    uv_sorted = jnp.take_along_axis(uvs, order[..., None], axis=1)     # [P, N, 2]
    if n_padded != N:
        # Edge-replicate so padded points reuse the last real point's rows.
        uv_sorted = jnp.pad(uv_sorted, ((0, 0), (0, n_padded - N), (0, 0)),
                            mode="edge")
    uv_t = jnp.transpose(uv_sorted, (0, 2, 1))                         # [P, 2, Np]

    # ---- per-(player, N-tile) active row-slab range (scalar prefetch) -------
    fy_sorted = ((uv_t[:, 1, :] + 1.0) * H - 1.0) * 0.5                # [P, Np]
    y0 = jnp.floor(fy_sorted).astype(jnp.int32).reshape(P, n_blocks, n_tile)
    row_lo = jnp.clip(jnp.min(y0, axis=2), 0, H_pad - 1)
    row_hi = jnp.clip(jnp.max(y0, axis=2) + 1, 0, H_pad - 1)
    slab_lo = (row_lo // R).reshape(-1).astype(jnp.int32)              # [P*nb]
    slab_hi = (row_hi // R).reshape(-1).astype(jnp.int32)              # [P*nb]

    kernel = _make_uv_sh_kernel(H=H, W=W, W_pad=W_pad, C_pad=C_pad, R=R,
                                n_blocks=n_blocks, mxu_dtype=fm_dtype,
                                sh_scale_channels=sh_scale_channels,
                                sh_scale=sh_scale)

    out = pl.pallas_call(
        kernel,
        out_shape=jax.ShapeDtypeStruct((P, C_pad, n_padded), jnp.float32),
        grid_spec=pltpu.PrefetchScalarGridSpec(
            num_scalar_prefetch=2,
            grid=(P, n_blocks),
            in_specs=[
                # uv tile, lane-dense.
                pl.BlockSpec((None, 2, n_tile),
                             lambda p, n, lo, hi: (p, 0, n)),
                # Full per-player feature map: block index only depends on p,
                # so it is DMA'd once per player and stays resident in VMEM.
                pl.BlockSpec((None, n_slabs, R * C_pad, W_pad),
                             lambda p, n, lo, hi: (p, 0, 0, 0)),
            ],
            out_specs=pl.BlockSpec((None, C_pad, n_tile),
                                   lambda p, n, lo, hi: (p, 0, n)),
        ),
        compiler_params=pltpu.CompilerParams(
            dimension_semantics=("parallel", "parallel"),
            # Keep within v7x's 64 MiB physical VMEM; plenty for v5e/v6e.
            vmem_limit_bytes=64 * 1024 * 1024),
    )(slab_lo, slab_hi, uv_t, fm)

    # Back to the PyTorch-facing layout [P, N, C], restoring original order.
    feats = jnp.transpose(out[:, :C, :N], (0, 2, 1))                   # [P, N, C]
    feats = jnp.take_along_axis(feats, inv_order[..., None], axis=1)   # unsort
    return feats


class SHEncoderPallas:
    """JAX/Pallas port of SHEncoder(encoder='uv') forward."""

    def __init__(self, max_sh_degree=1, encoder="uv", num_players=1,
                 resolution=256, key=None, fm_dtype=jnp.bfloat16):
        if encoder != "uv":
            # TODO(synk): 'hash'/'triplane' encoders wrap tinycudann fused MLPs
            # (HashGrid / FullyFusedMLP / CutlassMLP); only 'uv' is ported.
            raise Exception("only the 'uv' encoder is implemented in the Pallas port")
        self.num_players = num_players
        self.num_shs = (max_sh_degree + 1) ** 2
        self.num_channels = self.num_shs * 3
        self.input_channels = 2
        self.fm_dtype = fm_dtype
        if key is None:
            key = jax.random.PRNGKey(0)
        # UVEncoder uses nn.Parameter(torch.zeros(...)); use a small random
        # init so the kernel result is non-trivial to verify.
        self.feature_map = 0.01 * jax.random.normal(
            key, (num_players, self.num_channels, resolution, resolution),
            dtype=jnp.float32)

    def __call__(self, inp):
        if inp.shape[0] != self.num_players or inp.shape[2] != self.input_channels:
            raise Exception("input shape is not allowed")
        feats = uv_grid_sample_sh_pallas(
            inp, self.feature_map, sh_scale_channels=3, sh_scale=20.0,
            fm_dtype=self.fm_dtype)                       # [P, N, num_shs*3]
        # shs[:, 0, :] *= 20 is already fused into the kernel finalize step.
        return feats.reshape(-1, self.num_shs, 3)


def _reference_sh_encode(uvs, fm, num_shs):
    """Pure-JAX grid_sample (bilinear, zeros, align_corners=False) + SH scale."""
    P, C, H, W = fm.shape
    x = uvs[..., 0]
    y = uvs[..., 1]
    fx = ((x + 1.0) * W - 1.0) * 0.5
    fy = ((y + 1.0) * H - 1.0) * 0.5
    x0 = jnp.floor(fx).astype(jnp.int32)
    y0 = jnp.floor(fy).astype(jnp.int32)
    wx1 = fx - x0
    wx0 = 1.0 - wx1
    wy1 = fy - y0
    wy0 = 1.0 - wy1

    def gather(xi, yi):
        valid = ((xi >= 0) & (xi < W) & (yi >= 0) & (yi < H)).astype(jnp.float32)
        xc = jnp.clip(xi, 0, W - 1)
        yc = jnp.clip(yi, 0, H - 1)
        vals = jax.vmap(lambda f, yy, xx: f[:, yy, xx])(fm, yc, xc)  # [P, C, N]
        return vals * valid[:, None, :]

    v00 = gather(x0, y0)
    v01 = gather(x0 + 1, y0)
    v10 = gather(x0, y0 + 1)
    v11 = gather(x0 + 1, y0 + 1)
    out = (v00 * (wx0 * wy0)[:, None, :] + v01 * (wx1 * wy0)[:, None, :]
           + v10 * (wx0 * wy1)[:, None, :] + v11 * (wx1 * wy1)[:, None, :])
    feats = jnp.transpose(out, (0, 2, 1))                # [P, N, C]
    shs = feats.reshape(-1, num_shs, 3)
    shs = shs.at[:, 0, :].multiply(20.0)
    return shs


if __name__ == "__main__":
    key = jax.random.PRNGKey(0)
    k_fm, k_uv = jax.random.split(key)

    num_players = 2
    num_points = 64
    resolution = 16
    max_sh_degree = 1          # num_shs = 4, channels = 12

    enc = SHEncoderPallas(max_sh_degree=max_sh_degree, encoder="uv",
                          num_players=num_players, resolution=resolution,
                          key=k_fm)

    # uv coordinates mostly in [-1, 1] plus slight overshoot to exercise the
    # padding_mode='zeros' edge behaviour; shape [P, N, 2].
    uvs = jax.random.uniform(k_uv, (num_players, num_points, 2),
                             dtype=jnp.float32, minval=-1.05, maxval=1.05)

    out = jax.block_until_ready(enc(uvs))

    ref = _reference_sh_encode(uvs, enc.feature_map, enc.num_shs)
    assert out.shape == (num_players * num_points, enc.num_shs, 3)
    err = float(jnp.max(jnp.abs(out - ref)))
    # fm and wx are fed to the MXU in bf16 (perf item 4); expected
    # quantization error here is well under 1e-2.  Use fm_dtype=jnp.float32
    # in uv_grid_sample_sh_pallas / SHEncoderPallas for tight f32 parity.
    assert err < 3e-2, err
    print("KERNEL_OK")
</pallas_src>

<mosaic_0001>
module attributes {stable_mosaic.version = 11 : i64} {
  func.func @kernel(%arg0: i32, %arg1: i32, %arg2: memref<2xi32, #tpu.memory_space<smem>>, %arg3: memref<2xi32, #tpu.memory_space<smem>>, %arg4: memref<1x2x128xf32, #tpu.memory_space<vmem>>, %arg5: memref<1x2x128x128xbf16, #tpu.memory_space<vmem>>, %arg6: memref<1x16x128xf32, #tpu.memory_space<vmem>>) attributes {dimension_semantics = [#tpu.dimension_semantics<parallel>, #tpu.dimension_semantics<parallel>], iteration_bounds = array<i64: 2, 1>, scalar_prefetch = 2 : i64, scratch_operands = 0 : i64, tpu.core_type = #tpu.core_type<tc>, window_params = [{transform_indices = @transform_0, window_bounds = array<i64: 1, 2, 128>}, {transform_indices = @transform_1, window_bounds = array<i64: 1, 2, 128, 128>}, {transform_indices = @transform_2, window_bounds = array<i64: 1, 16, 128>}]} {
    %c1_i32 = arith.constant 1 : i32
    %0 = arith.muli %arg0, %c1_i32 : i32
    %1 = arith.addi %0, %arg1 : i32
    %2 = arith.index_cast %1 : i32 to index
    %3 = memref.load %arg2[%2] : memref<2xi32, #tpu.memory_space<smem>>
    %4 = arith.index_cast %1 : i32 to index
    %5 = memref.load %arg3[%4] : memref<2xi32, #tpu.memory_space<smem>>
    %c0 = arith.constant 0 : index
    %c0_0 = arith.constant 0 : index
    %c0_1 = arith.constant 0 : index
    %6 = vector.load %arg4[%c0, %c0_0, %c0_1] : memref<1x2x128xf32, #tpu.memory_space<vmem>>, vector<1x2x128xf32>
    %7 = vector.shape_cast %6 : vector<1x2x128xf32> to vector<2x128xf32>
    %8 = vector.extract_strided_slice %7 {offsets = [0, 0], sizes = [1, 128], strides = [1, 1]} : vector<2x128xf32> to vector<1x128xf32>
    %cst = arith.constant 1.000000e+00 : f32
    %9 = vector.broadcast %cst : f32 to vector<1x128xf32>
    %10 = arith.addf %8, %9 : vector<1x128xf32>
    %cst_2 = arith.constant 1.600000e+01 : f32
    %11 = vector.broadcast %cst_2 : f32 to vector<1x128xf32>
    %12 = arith.mulf %10, %11 : vector<1x128xf32>
    %cst_3 = arith.constant 1.000000e+00 : f32
    %13 = vector.broadcast %cst_3 : f32 to vector<1x128xf32>
    %14 = arith.subf %12, %13 : vector<1x128xf32>
    %cst_4 = arith.constant 5.000000e-01 : f32
    %15 = vector.broadcast %cst_4 : f32 to vector<1x128xf32>
    %16 = arith.mulf %14, %15 : vector<1x128xf32>
    %17 = vector.extract_strided_slice %7 {offsets = [1, 0], sizes = [1, 128], strides = [1, 1]} : vector<2x128xf32> to vector<1x128xf32>
    %cst_5 = arith.constant 1.000000e+00 : f32
    %18 = vector.broadcast %cst_5 : f32 to vector<1x128xf32>
    %19 = arith.addf %17, %18 : vector<1x128xf32>
    %cst_6 = arith.constant 1.600000e+01 : f32
    %20 = vector.broadcast %cst_6 : f32 to vector<1x128xf32>
    %21 = arith.mulf %19, %20 : vector<1x128xf32>
    %cst_7 = arith.constant 1.000000e+00 : f32
    %22 = vector.broadcast %cst_7 : f32 to vector<1x128xf32>
    %23 = arith.subf %21, %22 : vector<1x128xf32>
    %cst_8 = arith.constant 5.000000e-01 : f32
    %24 = vector.broadcast %cst_8 : f32 to vector<1x128xf32>
    %25 = arith.mulf %23, %24 : vector<1x128xf32>
    %26 = tpu.iota {dimensions = array<i32: 0>} : vector<128x128xi32>
    %27 = arith.sitofp %26 : vector<128x128xi32> to vector<128x128xf32>
    %28 = vector.broadcast %16 : vector<1x128xf32> to vector<128x128xf32>
    %29 = arith.subf %27, %28 : vector<128x128xf32>
    %30 = math.absf %29 : vector<128x128xf32>
    %cst_9 = arith.constant 1.000000e+00 : f32
    %31 = vector.broadcast %cst_9 : f32 to vector<128x128xf32>
    %32 = arith.subf %31, %30 : vector<128x128xf32>
    %cst_10 = arith.constant 0.000000e+00 : f32
    %33 = vector.broadcast %cst_10 : f32 to vector<128x128xf32>
    %34 = arith.maximumf %33, %32 : vector<128x128xf32>
    %35 = arith.truncf %34 : vector<128x128xf32> to vector<128x128xbf16>
    %cst_11 = arith.constant 0.000000e+00 : f32
    %36 = vector.broadcast %cst_11 : f32 to vector<16x128xf32>
    %c0_12 = arith.constant 0 : index
    %c0_13 = arith.constant 0 : index
    %c0_14 = arith.constant 0 : index
    %37 = vector.load %arg6[%c0_12, %c0_13, %c0_14] : memref<1x16x128xf32, #tpu.memory_space<vmem>>, vector<1x16x128xf32>
    %38 = vector.shape_cast %37 : vector<1x16x128xf32> to vector<16x128xf32>
    %39 = vector.shape_cast %36 : vector<16x128xf32> to vector<1x16x128xf32>
    tpu.vector_store %arg6[%c0_12, %c0_13, %c0_14], %39 {strides = array<i32>} : memref<1x16x128xf32, #tpu.memory_space<vmem>>, vector<1x16x128xf32>,
    %c1_i32_15 = arith.constant 1 : i32
    %40 = arith.addi %5, %c1_i32_15 : i32
    %c0_i32 = arith.constant 0 : i32
    %41 = arith.subi %40, %3 : i32
    %42 = arith.addi %3, %41 : i32
    %c1_i32_16 = arith.constant 1 : i32
    scf.for %arg7 = %3 to %42 step %c1_i32_16  : i32 {
      %c0_25 = arith.constant 0 : index
      %56 = arith.index_cast %arg7 : i32 to index
      %c0_26 = arith.constant 0 : index
      %c0_27 = arith.constant 0 : index
      %57 = vector.load %arg5[%c0_25, %56, %c0_26, %c0_27] : memref<1x2x128x128xbf16, #tpu.memory_space<vmem>>, vector<1x1x128x128xbf16>
      %58 = vector.shape_cast %57 : vector<1x1x128x128xbf16> to vector<128x128xbf16>
      %cst_28 = arith.constant dense<0.000000e+00> : vector<128x128xf32>
      %59 = tpu.matmul %58, %35, %cst_28 {dimension_numbers = #tpu.dot_dimension_numbers<[1], [0], [0], [1], [0, 0, 1, 1], [], []>} : vector<128x128xbf16>, vector<128x128xbf16>, vector<128x128xf32> -> vector<128x128xf32>
      %c8_i32 = arith.constant 8 : i32
      %60 = arith.muli %arg7, %c8_i32 : i32
      %61 = arith.sitofp %60 : i32 to f32
      %cst_29 = arith.constant 0.000000e+00 : f32
      %62 = arith.addf %61, %cst_29 : f32
      %63 = vector.broadcast %62 : f32 to vector<1x128xf32>
      %64 = arith.subf %63, %25 : vector<1x128xf32>
      %65 = math.absf %64 : vector<1x128xf32>
      %cst_30 = arith.constant 1.000000e+00 : f32
      %66 = vector.broadcast %cst_30 : f32 to vector<1x128xf32>
      %67 = arith.subf %66, %65 : vector<1x128xf32>
      %cst_31 = arith.constant 0.000000e+00 : f32
      %68 = vector.broadcast %cst_31 : f32 to vector<1x128xf32>
      %69 = arith.maximumf %68, %67 : vector<1x128xf32>
      %70 = vector.extract_strided_slice %59 {offsets = [0, 0], sizes = [16, 128], strides = [1, 1]} : vector<128x128xf32> to vector<16x128xf32>
      %71 = vector.broadcast %69 : vector<1x128xf32> to vector<16x128xf32>
      %72 = arith.mulf %70, %71 : vector<16x128xf32>
      %cst_32 = arith.constant 1.000000e+00 : f32
      %73 = arith.addf %61, %cst_32 : f32
      %74 = vector.broadcast %73 : f32 to vector<1x128xf32>
      %75 = arith.subf %74, %25 : vector<1x128xf32>
      %76 = math.absf %75 : vector<1x128xf32>
      %cst_33 = arith.constant 1.000000e+00 : f32
      %77 = vector.broadcast %cst_33 : f32 to vector<1x128xf32>
      %78 = arith.subf %77, %76 : vector<1x128xf32>
      %cst_34 = arith.constant 0.000000e+00 : f32
      %79 = vector.broadcast %cst_34 : f32 to vector<1x128xf32>
      %80 = arith.maximumf %79, %78 : vector<1x128xf32>
      %81 = vector.extract_strided_slice %59 {offsets = [16, 0], sizes = [16, 128], strides = [1, 1]} : vector<128x128xf32> to vector<16x128xf32>
      %82 = vector.broadcast %80 : vector<1x128xf32> to vector<16x128xf32>
      %83 = arith.mulf %81, %82 : vector<16x128xf32>
      %84 = arith.addf %72, %83 : vector<16x128xf32>
      %cst_35 = arith.constant 2.000000e+00 : f32
      %85 = arith.addf %61, %cst_35 : f32
      %86 = vector.broadcast %85 : f32 to vector<1x128xf32>
      %87 = arith.subf %86, %25 : vector<1x128xf32>
      %88 = math.absf %87 : vector<1x128xf32>
      %cst_36 = arith.constant 1.000000e+00 : f32
      %89 = vector.broadcast %cst_36 : f32 to vector<1x128xf32>
      %90 = arith.subf %89, %88 : vector<1x128xf32>
      %cst_37 = arith.constant 0.000000e+00 : f32
      %91 = vector.broadcast %cst_37 : f32 to vector<1x128xf32>
      %92 = arith.maximumf %91, %90 : vector<1x128xf32>
      %93 = vector.extract_strided_slice %59 {offsets = [32, 0], sizes = [16, 128], strides = [1, 1]} : vector<128x128xf32> to vector<16x128xf32>
      %94 = vector.broadcast %92 : vector<1x128xf32> to vector<16x128xf32>
      %95 = arith.mulf %93, %94 : vector<16x128xf32>
      %96 = arith.addf %84, %95 : vector<16x128xf32>
      %cst_38 = arith.constant 3.000000e+00 : f32
      %97 = arith.addf %61, %cst_38 : f32
      %98 = vector.broadcast %97 : f32 to vector<1x128xf32>
      %99 = arith.subf %98, %25 : vector<1x128xf32>
      %100 = math.absf %99 : vector<1x128xf32>
      %cst_39 = arith.constant 1.000000e+00 : f32
      %101 = vector.broadcast %cst_39 : f32 to vector<1x128xf32>
      %102 = arith.subf %101, %100 : vector<1x128xf32>
      %cst_40 = arith.constant 0.000000e+00 : f32
      %103 = vector.broadcast %cst_40 : f32 to vector<1x128xf32>
      %104 = arith.maximumf %103, %102 : vector<1x128xf32>
      %105 = vector.extract_strided_slice %59 {offsets = [48, 0], sizes = [16, 128], strides = [1, 1]} : vector<128x128xf32> to vector<16x128xf32>
      %106 = vector.broadcast %104 : vector<1x128xf32> to vector<16x128xf32>
      %107 = arith.mulf %105, %106 : vector<16x128xf32>
      %108 = arith.addf %96, %107 : vector<16x128xf32>
      %cst_41 = arith.constant 4.000000e+00 : f32
      %109 = arith.addf %61, %cst_41 : f32
      %110 = vector.broadcast %109 : f32 to vector<1x128xf32>
      %111 = arith.subf %110, %25 : vector<1x128xf32>
      %112 = math.absf %111 : vector<1x128xf32>
      %cst_42 = arith.constant 1.000000e+00 : f32
      %113 = vector.broadcast %cst_42 : f32 to vector<1x128xf32>
      %114 = arith.subf %113, %112 : vector<1x128xf32>
      %cst_43 = arith.constant 0.000000e+00 : f32
      %115 = vector.broadcast %cst_43 : f32 to vector<1x128xf32>
      %116 = arith.maximumf %115, %114 : vector<1x128xf32>
      %117 = vector.extract_strided_slice %59 {offsets = [64, 0], sizes = [16, 128], strides = [1, 1]} : vector<128x128xf32> to vector<16x128xf32>
      %118 = vector.broadcast %116 : vector<1x128xf32> to vector<16x128xf32>
      %119 = arith.mulf %117, %118 : vector<16x128xf32>
      %120 = arith.addf %108, %119 : vector<16x128xf32>
      %cst_44 = arith.constant 5.000000e+00 : f32
      %121 = arith.addf %61, %cst_44 : f32
      %122 = vector.broadcast %121 : f32 to vector<1x128xf32>
      %123 = arith.subf %122, %25 : vector<1x128xf32>
      %124 = math.absf %123 : vector<1x128xf32>
      %cst_45 = arith.constant 1.000000e+00 : f32
      %125 = vector.broadcast %cst_45 : f32 to vector<1x128xf32>
      %126 = arith.subf %125, %124 : vector<1x128xf32>
      %cst_46 = arith.constant 0.000000e+00 : f32
      %127 = vector.broadcast %cst_46 : f32 to vector<1x128xf32>
      %128 = arith.maximumf %127, %126 : vector<1x128xf32>
      %129 = vector.extract_strided_slice %59 {offsets = [80, 0], sizes = [16, 128], strides = [1, 1]} : vector<128x128xf32> to vector<16x128xf32>
      %130 = vector.broadcast %128 : vector<1x128xf32> to vector<16x128xf32>
      %131 = arith.mulf %129, %130 : vector<16x128xf32>
      %132 = arith.addf %120, %131 : vector<16x128xf32>
      %cst_47 = arith.constant 6.000000e+00 : f32
      %133 = arith.addf %61, %cst_47 : f32
      %134 = vector.broadcast %133 : f32 to vector<1x128xf32>
      %135 = arith.subf %134, %25 : vector<1x128xf32>
      %136 = math.absf %135 : vector<1x128xf32>
      %cst_48 = arith.constant 1.000000e+00 : f32
      %137 = vector.broadcast %cst_48 : f32 to vector<1x128xf32>
      %138 = arith.subf %137, %136 : vector<1x128xf32>
      %cst_49 = arith.constant 0.000000e+00 : f32
      %139 = vector.broadcast %cst_49 : f32 to vector<1x128xf32>
      %140 = arith.maximumf %139, %138 : vector<1x128xf32>
      %141 = vector.extract_strided_slice %59 {offsets = [96, 0], sizes = [16, 128], strides = [1, 1]} : vector<128x128xf32> to vector<16x128xf32>
      %142 = vector.broadcast %140 : vector<1x128xf32> to vector<16x128xf32>
      %143 = arith.mulf %141, %142 : vector<16x128xf32>
      %144 = arith.addf %132, %143 : vector<16x128xf32>
      %cst_50 = arith.constant 7.000000e+00 : f32
      %145 = arith.addf %61, %cst_50 : f32
      %146 = vector.broadcast %145 : f32 to vector<1x128xf32>
      %147 = arith.subf %146, %25 : vector<1x128xf32>
      %148 = math.absf %147 : vector<1x128xf32>
      %cst_51 = arith.constant 1.000000e+00 : f32
      %149 = vector.broadcast %cst_51 : f32 to vector<1x128xf32>
      %150 = arith.subf %149, %148 : vector<1x128xf32>
      %cst_52 = arith.constant 0.000000e+00 : f32
      %151 = vector.broadcast %cst_52 : f32 to vector<1x128xf32>
      %152 = arith.maximumf %151, %150 : vector<1x128xf32>
      %153 = vector.extract_strided_slice %59 {offsets = [112, 0], sizes = [16, 128], strides = [1, 1]} : vector<128x128xf32> to vector<16x128xf32>
      %154 = vector.broadcast %152 : vector<1x128xf32> to vector<16x128xf32>
      %155 = arith.mulf %153, %154 : vector<16x128xf32>
      %156 = arith.addf %144, %155 : vector<16x128xf32>
      %c0_53 = arith.constant 0 : index
      %c0_54 = arith.constant 0 : index
      %c0_55 = arith.constant 0 : index
      %157 = vector.load %arg6[%c0_53, %c0_54, %c0_55] : memref<1x16x128xf32, #tpu.memory_space<vmem>>, vector<1x16x128xf32>
      %158 = vector.shape_cast %157 : vector<1x16x128xf32> to vector<16x128xf32>
      %159 = arith.addf %158, %156 : vector<16x128xf32>
      %c0_56 = arith.constant 0 : index
      %c0_57 = arith.constant 0 : index
      %c0_58 = arith.constant 0 : index
      %160 = vector.load %arg6[%c0_56, %c0_57, %c0_58] : memref<1x16x128xf32, #tpu.memory_space<vmem>>, vector<1x16x128xf32>
      %161 = vector.shape_cast %160 : vector<1x16x128xf32> to vector<16x128xf32>
      %162 = vector.shape_cast %159 : vector<16x128xf32> to vector<1x16x128xf32>
      tpu.vector_store %arg6[%c0_56, %c0_57, %c0_58], %162 {strides = array<i32>} : memref<1x16x128xf32, #tpu.memory_space<vmem>>, vector<1x16x128xf32>,
    }
    %43 = tpu.iota {dimensions = array<i32: 0>} : vector<16x1xi32>
    %c3_i32 = arith.constant 3 : i32
    %44 = vector.broadcast %c3_i32 : i32 to vector<16x1xi32>
    %45 = arith.cmpi slt, %43, %44 : vector<16x1xi32>
    %cst_17 = arith.constant 2.000000e+01 : f32
    %cst_18 = arith.constant 1.000000e+00 : f32
    %46 = vector.broadcast %cst_17 : f32 to vector<16x1xf32>
    %47 = vector.broadcast %cst_18 : f32 to vector<16x1xf32>
    %48 = arith.select %45, %46, %47 : vector<16x1xi1>, vector<16x1xf32>
    %c0_19 = arith.constant 0 : index
    %c0_20 = arith.constant 0 : index
    %c0_21 = arith.constant 0 : index
    %49 = vector.load %arg6[%c0_19, %c0_20, %c0_21] : memref<1x16x128xf32, #tpu.memory_space<vmem>>, vector<1x16x128xf32>
    %50 = vector.shape_cast %49 : vector<1x16x128xf32> to vector<16x128xf32>
    %51 = vector.broadcast %48 : vector<16x1xf32> to vector<16x128xf32>
    %52 = arith.mulf %50, %51 : vector<16x128xf32>
    %c0_22 = arith.constant 0 : index
    %c0_23 = arith.constant 0 : index
    %c0_24 = arith.constant 0 : index
    %53 = vector.load %arg6[%c0_22, %c0_23, %c0_24] : memref<1x16x128xf32, #tpu.memory_space<vmem>>, vector<1x16x128xf32>
    %54 = vector.shape_cast %53 : vector<1x16x128xf32> to vector<16x128xf32>
    %55 = vector.shape_cast %52 : vector<16x128xf32> to vector<1x16x128xf32>
    tpu.vector_store %arg6[%c0_22, %c0_23, %c0_24], %55 {strides = array<i32>} : memref<1x16x128xf32, #tpu.memory_space<vmem>>, vector<1x16x128xf32>,
    return
  }
  func.func @transform_0(%arg0: i32, %arg1: i32, %arg2: memref<2xi32, #tpu.memory_space<smem>>, %arg3: memref<2xi32, #tpu.memory_space<smem>>) -> (i32, i32, i32) {
    %c0_i32 = arith.constant 0 : i32
    %c0_i32_0 = arith.constant 0 : i32
    return %arg0, %c0_i32, %arg1 : i32, i32, i32
  }
  func.func @transform_1(%arg0: i32, %arg1: i32, %arg2: memref<2xi32, #tpu.memory_space<smem>>, %arg3: memref<2xi32, #tpu.memory_space<smem>>) -> (i32, i32, i32, i32) {
    %c0_i32 = arith.constant 0 : i32
    %c0_i32_0 = arith.constant 0 : i32
    %c0_i32_1 = arith.constant 0 : i32
    %c0_i32_2 = arith.constant 0 : i32
    return %arg0, %c0_i32, %c0_i32_0, %c0_i32_1 : i32, i32, i32, i32
  }
  func.func @transform_2(%arg0: i32, %arg1: i32, %arg2: memref<2xi32, #tpu.memory_space<smem>>, %arg3: memref<2xi32, #tpu.memory_space<smem>>) -> (i32, i32, i32) {
    %c0_i32 = arith.constant 0 : i32
    %c0_i32_0 = arith.constant 0 : i32
    return %arg0, %c0_i32, %arg1 : i32, i32, i32
  }
}

</mosaic_0001>

<bundles_post_ra>
// kernel: tpu_custom_call.1
= control target key start
LH: loop header
LB: loop body
LE: loop exit
PB: predicated region body
PF: predicated region fallthrough
CT: control target
= control target key end

     0   :  { %s1134_s15 = smov [#allocation3]   ;;  %s1482_s0 = inlined_call_operand.hbm [shape: s32[2], index: 0, kind: input, shape index: {}]   ;;  %s1483_s2 = inlined_call_operand.hbm [shape: f32[2,2,128], index: 2, kind: input, shape index: {}]   ;;  %s1484_s3 = inlined_call_operand.hbm [shape: bf16[2,2,128,128], index: 3, kind: input, shape index: {}]   ;;  %s1485_s4 = inlined_call_operand.hbm [shape: f32[2,16,128], index: 4, kind: output, shape index: {}]   ;;  %s1486_s1 = inlined_call_operand.vmem [shape: s32[2], index: 1, kind: input, shape index: {}]  }
   0x1   :  { %10 = dma.hbm_to_smem %s1482_s0, 16, %s1134_s15, [#allocation2] }
   0x2   :  { %s11_s20 = sshll.u32 %s1486_s1, 4  ;;  %s12_s20 = int_to_ptr.vmem [resolvable:$true] %s11_s20 }
   0x3   :  { %s970_s21 = scalar_lea.vmem %s12_s20, 16  ;;  %p975_p1 = scmp.lt.s32.totalorder %s12_s20, %s12_s20 }
   0x4   :  { %p971_p0 = scmp.ne.s32.totalorder %s12_s20, %s970_s21  ;;  %p976_p2 = scmp.lt.s32.totalorder %s970_s21, %s970_s21 }
   0x6   :  { %p977_p3 = por %p976_p2, %p975_p1 }
   0x8   :  { %p978_p4 = pnand %p977_p3, %p971_p0 }
   0xa   :  { %981 = shalt.err (!%p978_p4)  }
   0xb   :  { %s1135_s22 = smov [#allocation4]  }
   0xc   :  { %14 = dma.vmem_to_smem %s12_s20, 16, %s1135_s22, [#allocation2] }
   0xd   :  { %1092 = dma.done.wait [#allocation2], 32 }
   0xe   :  { %1093 = vsyncadd [#allocation2], 4294967264 }
   0xf   :  { %16 = sfence }
  0x10   :  { %17 = vsyncpa [#allocation6], 0 }
  0x11   :  { %19 = vsyncpa [#allocation6 + $0x1], 0 }
  0x12   :  { %20 = vsyncpa [#allocation9], 0 }
  0x13   :  { %22 = vsyncpa [#allocation9 + $0x1], 0 }
  0x14   :  { %23 = vsyncpa [#allocation7], 0 }
  0x15   :  { %25 = vsyncpa [#allocation7 + $0x1], 0  ;;  %s1176_s0 = smov 0   ;;  %s1178_s1 = smov 0  }
  0x16   :  { %s1180_s23 = smov 0   ;;  %s1182_s24 = smov 0  }
  0x17   :  { %s1184_s25 = smov 0   ;;  %s1186_s26 = smov 0  }
  0x18 LB: > { %s774_s27 = sadd.s32 4294967295, %s1128_s26   ;;  %s775_s28 = sadd.s32 4294967294, %s1128_s26   ;;  %s1128_s26 = sphi %s1186_s26, %s31_s26   ;;  %s1124_s25 = sphi %s1184_s25, %s1498_s25   ;;  %s1120_s24 = sphi %s1182_s24, %s1497_s24   ;;  %s1116_s23 = sphi %s1180_s23, %s1496_s23   ;;  %s1112_s1 = sphi %s1178_s1, %s1495_s1   ;;  %s1108_s0 = sphi %s1176_s0, %s1494_s0  }
  0x19   : > { %s43_s29 = sadd.s32 1, %s1124_s25  ;;  %s52_s30 = sadd.s32 1, %s1116_s23 }
  0x1a   : > { %p45_p5 = scmp.ge.s32.totalorder %s43_s29, 2  ;;  %p59_p6 = scmp.ne.s32.totalorder %s1116_s23, %s1112_s1 }
  0x1b   : > { %p60_p7 = scmp.eq.s32.totalorder %s1128_s26, 0  ;;  %p65_p8 = scmp.ne.s32.totalorder %s1112_s1, %s1108_s0 }
  0x1c   : > { %s1500_s29 = smov (%p45_p5, %s43_s29), 0  ;;  %p66_p10 = scmp.eq.s32.totalorder %s774_s27, 0 }
  0x1d   : > { %p1217_p9 = por %p60_p7, %p59_p6  ;;  %s47_s6 = ssub.s32 %s1124_s25, %s1500_s29 }
  0x1e   : > { %p117_p11 = scmp.eq.s32.totalorder %s774_s27, 1  ;;  %p50_p12 = scmp.eq.s32.totalorder %s47_s6, 0 }
  0x1f   : > { %p1223_p13 = por %p66_p10, %p65_p8  ;;  %p123_p1 = scmp.eq.s32.totalorder %s775_s28, 1 }
  0x20   : > { %p1227_p0 = por %p117_p11, %p59_p6  ;;  %p888_p4 = scmp.lt.s32.totalorder %s1128_s26, 2 }
  0x21   : > { %s1232_s9 = scalar_select %p50_p12, %s1116_s23, %s52_s30  }
  0x22   : > { %p1234_p2 = por %p123_p1, %p65_p8  ;;  %s1241_s11 = sand.u32 1, %s1116_s23  }
  0x23   : > { %s778_s12 = sshll.u32 %s1241_s11, 1  ;;  %s779_s13 = sshll.u32 %s1124_s25, 5 }
  0x24   : > { %s153_s16 = scalar_lea.hbm %s1483_s2, %s779_s13  ;;  %s147_s17 = scalar_lea.vmem [#allocation5], %s778_s12 }
  0x25   : > { %s155_s18 = sshll.u32 %s147_s17, 4  ;;  %p1250_p5 = pnand %p888_p4, %p1217_p9  ;;  %s156_s18 = int_to_ptr.vmem [resolvable:$true] %s155_s18 }
  0x26   : > { %p783_p6 = scmp.ge.s32.totalorder %s1128_s26, 1  ;;  %p181_p7 = scmp.lt.s32.totalorder %s1128_s26, 3 }
  0x27   : > { %s144_s20 = scalar_lea.sflag [#allocation6], %s1241_s11  ;;  %p984_p8 = pneg %p1250_p5 }
  0x28   : > { %s995_s21 = scalar_lea.vmem %s156_s18, 32  ;;  %s1136_s22 = smov [#allocation5]  }
  0x29   : > { %p996_p10 = scmp.ne.s32.totalorder %s156_s18, %s995_s21  ;;  %s1000_s27 = sshll.u32 %s1136_s22, 4  ;;  %s1001_s27 = int_to_ptr.vmem [resolvable:$false] %s1000_s27 }
  0x2a   : > { %s1002_s28 = scalar_lea.vmem %s1001_s27, 64  ;;  %p1003_p9 = scmp.lt.s32.totalorder %s156_s18, %s1001_s27 }
  0x2b   : > { %p998_p11 = pnand %p996_p10, %p984_p8  ;;  %p1004_p1 = scmp.lt.s32.totalorder %s1002_s28, %s995_s21 }
  0x2d   : > { %p999_p12 = pneg %p998_p11  ;;  %p1005_p4 = por %p1004_p1, %p1003_p9 }
  0x2f   : > { %p1006_p3 = pnand %p1005_p4, %p999_p12 }
  0x31   : > { %1009 = shalt.err (!%p1006_p3)
}
  0x32   : > { %880 = dma.hbm_to_vmem [thread:$0]  (!%p1250_p5), %s153_s16, 32, %s156_s18, %s144_s20  }
  0x33   : > { %p1268_p10 = pnand %p783_p6, %p181_p7  ;;  %s780_s5 = sshll.u32 %s1241_s11, 7 }
  0x34   : > { %s804_s6 = sshll.u32 %s1124_s25, 11  ;;  %s166_s15 = scalar_lea.vmem [#allocation8], %s780_s5 }
  0x35   : > { %s172_s14 = scalar_lea.hbm %s1484_s3, %s804_s6  ;;  %s173_s17 = sshll.u32 %s166_s15, 4  ;;  %s174_s17 = int_to_ptr.vmem [resolvable:$true] %s173_s17 }
  0x36   : > { %s163_s21 = scalar_lea.sflag [#allocation9], %s1241_s11  ;;  %s1023_s22 = scalar_lea.vmem %s174_s17, 2048 }
  0x37   : > { %p1024_p3 = scmp.ne.s32.totalorder %s174_s17, %s1023_s22  ;;  %s1137_s16 = smov [#allocation8]  }
  0x38   : > { %s1028_s18 = sshll.u32 %s1137_s16, 4  ;;  %s1029_s18 = int_to_ptr.vmem [resolvable:$false] %s1028_s18 }
  0x39   : > { %p1026_p11 = pnand %p1024_p3, %p984_p8  ;;  %s1030_s20 = scalar_lea.vmem %s1029_s18, 4096 }
  0x3a   : > { %p1031_p6 = scmp.lt.s32.totalorder %s174_s17, %s1029_s18  ;;  %p1032_p7 = scmp.lt.s32.totalorder %s1030_s20, %s1023_s22 }
  0x3b   : > { %p1027_p12 = pneg %p1026_p11 }
  0x3c   : > { %p1033_p9 = por %p1032_p7, %p1031_p6 }
  0x3e   : > { %p1034_p1 = pnand %p1033_p9, %p1027_p12 }
  0x40   : > { %1037 = shalt.err (!%p1034_p1)
}
  0x41   : > { %s1138_s27 = smov 64   ;;  %s1139_s28 = smov 4  }
  0x42   : > { %883 = dma.hbm_to_vmem [thread:$0]  (!%p1250_p5), %s172_s14, 2048, %s174_s17, %s163_s21, %s1138_s27, %s1138_s27, %s1139_s28  }
  0x43   : > { %185 = sbr.rel (%p1268_p10) target bundleno = 389 (0x185), region = 28  ;;  %s1286_s11 = sand.u32 (!%p1268_p10), 1, %s1112_s1  }
  0x44   : > { %s784_s5 = sshll.u32 (!%p1268_p10), %s1286_s11, 1  ;;  %s188_s6 = scalar_lea.sflag (!%p1268_p10), [#allocation6], %s1286_s11 }
  0x45   : > { %s191_s12 = scalar_lea.vmem (!%p1268_p10), [#allocation5], %s784_s5 }
  0x48   : > { %1095 = dma.done.wait (%p1223_p13), %s188_s6, 32  }
  0x49   : > { %1097 = vsyncadd (%p1223_p13), %s188_s6, 4294967264  ;;  %s785_s19 = sshll.u32 %s1286_s11, 7  ;;  %s197_s30 = scalar_lea.sflag [#allocation9], %s1286_s11 }
  0x4a   : > { %s1296_s13 = scalar_lea.vmem [#allocation8], %s785_s19 }
  0x4b   : > { %1099 = dma.done.wait (%p1223_p13), %s197_s30, 2048  }
  0x4c   : > { %1101 = vsyncadd (%p1223_p13), %s197_s30, 4294965248  ;;  %s786_s14 = sshll.u32 %s1286_s11, 4  ;;  %s1304_s15 = sld [smem:[#allocation3 + %s1120_s24]]   ;;  %v235_v0 = vlaneseq  ;;  %v1140_v1 = vmov 0.0   ;;  %v230_v3 = vld [vmem:[%s191_s12] sm:$0x3] }
  0x4d   : > { %s1307_s17 = sld [smem:[#allocation4 + %s1120_s24]]  ;;  %s1309_s21 = scalar_lea.vmem [#allocation10], %s786_s14  ;;  %v231_v4 = vadd.f32 1.0, %v230_v3 }
  0x4e   : > { %344 = vst [vmem:[%s1309_s21] sm:$0xff] %v1140_v1  ;;  %345 = vst [vmem:[%s1309_s21 + $0x8] sm:$0xff] %v1140_v1  ;;  %v1313_v2 = vshrl.u32 %v235_v0, 7 }
  0x4f   : > { %v232_v7 = vmul.f32 16.0, %v231_v4 }
  0x50   : > { %v237_v5 = vadd.s32 8, %v1313_v2  ;;  %v238_v6 = vadd.s32 16, %v1313_v2  ;;  %v239_v8 = vadd.s32 24, %v1313_v2  ;;  %v240_v9 = vadd.s32 32, %v1313_v2 }
  0x51   : > { %v241_v10 = vadd.s32 40, %v1313_v2  ;;  %v242_v11 = vadd.s32 48, %v1313_v2  ;;  %v243_v12 = vadd.s32 56, %v1313_v2  ;;  %v244_v13 = vadd.s32 64, %v1313_v2 }
  0x52   : > { %v245_v14 = vadd.s32 72, %v1313_v2  ;;  %v787_v15 = vadd.f32 -1.0, %v232_v7  ;;  %v246_v16 = vadd.s32 80, %v1313_v2  ;;  %v247_v17 = vadd.s32 88, %v1313_v2 }
  0x53   : > { %s346_s7 = sadd.s32 1, %s1307_s17  ;;  %v270_v18 = vsub.s32 0, %v1313_v2  ;;  %v248_v19 = vadd.s32 96, %v1313_v2  ;;  %v249_v20 = vadd.s32 104, %v1313_v2  ;;  %v250_v21 = vadd.s32 112, %v1313_v2 }
  0x54   : > { %v251_v22 = vadd.s32 120, %v1313_v2  ;;  %v1332_v23 = vmul.f32 0.5, %v787_v15  ;;  %v252_v24 = vcvt.s32.f32 %v1313_v2  ;;  %v253_v25 = vcvt.s32.f32 %v237_v5  ;;  %p729_p13 = scmp.ge.s32.totalorder %s1304_s15, %s346_s7 }
  0x55   : > { %v254_v26 = vcvt.s32.f32 %v238_v6  ;;  %v255_v27 = vcvt.s32.f32 %v239_v8  ;;  %v256_v28 = vcvt.s32.f32 %v240_v9  ;;  %v257_v29 = vcvt.s32.f32 %v241_v10 }
  0x56   : > { %v258_v30 = vcvt.s32.f32 %v242_v11  ;;  %v259_v31 = vcvt.s32.f32 %v243_v12  ;;  %v260_v32 = vcvt.s32.f32 %v244_v13  ;;  %v261_v33 = vcvt.s32.f32 %v245_v14 }
  0x57   : > { %v271_v34 = vrot.slane %v1332_v23, %v270_v18  ;;  %v262_v35 = vcvt.s32.f32 %v246_v16  ;;  %v263_v36 = vcvt.s32.f32 %v247_v17  ;;  %v264_v37 = vcvt.s32.f32 %v248_v19 }
  0x58   : > { %v265_v38 = vcvt.s32.f32 %v249_v20  ;;  %v266_v39 = vcvt.s32.f32 %v250_v21  ;;  %v267_v43 = vcvt.s32.f32 %v251_v22 }
  0x59   : > { %v272_v40 = vsub.f32 %v252_v24, %v271_v34  ;;  %v273_v41 = vsub.f32 %v253_v25, %v271_v34  ;;  %v274_v42 = vsub.f32 %v254_v26, %v271_v34  ;;  %v275_v44 = vsub.f32 %v255_v27, %v271_v34 }
  0x5a   : > { %v276_v45 = vsub.f32 %v256_v28, %v271_v34  ;;  %v277_v46 = vsub.f32 %v257_v29, %v271_v34  ;;  %v278_v47 = vsub.f32 %v258_v30, %v271_v34  ;;  %v279_v48 = vsub.f32 %v259_v31, %v271_v34 }
  0x5b   : > { %v280_v49 = vsub.f32 %v260_v32, %v271_v34  ;;  %v281_v50 = vsub.f32 %v261_v33, %v271_v34  ;;  %v282_v51 = vsub.f32 %v262_v35, %v271_v34  ;;  %v283_v52 = vsub.f32 %v263_v36, %v271_v34 }
  0x5c   : > { %v284_v53 = vsub.f32 %v264_v37, %v271_v34  ;;  %v285_v54 = vsub.f32 %v265_v38, %v271_v34  ;;  %v286_v55 = vsub.f32 %v266_v39, %v271_v34  ;;  %v288_v56 = vand.u32 2147483647, %v272_v40 }
  0x5d   : > { %v289_v57 = vand.u32 2147483647, %v273_v41  ;;  %v290_v58 = vand.u32 2147483647, %v274_v42  ;;  %v287_v59 = vsub.f32 %v267_v43, %v271_v34  ;;  %v291_v60 = vand.u32 2147483647, %v275_v44 }
  0x5e   : > { %v292_v61 = vand.u32 2147483647, %v276_v45  ;;  %v293_v62 = vand.u32 2147483647, %v277_v46  ;;  %v294_v63 = vand.u32 2147483647, %v278_v47 }
  0x5f   : > { %v295_v0 = vand.u32 2147483647, %v279_v48  ;;  %v296_v1 = vand.u32 2147483647, %v280_v49  ;;  %v297_v3 = vand.u32 2147483647, %v281_v50 }
  0x60   : > { %v298_v4 = vand.u32 2147483647, %v282_v51  ;;  %v299_v5 = vand.u32 2147483647, %v283_v52  ;;  %v300_v6 = vand.u32 2147483647, %v284_v53 }
  0x61   : > { %v301_v7 = vand.u32 2147483647, %v285_v54  ;;  %v302_v8 = vand.u32 2147483647, %v286_v55  ;;  %v303_v9 = vand.u32 2147483647, %v287_v59 }
  0x62   : > { %v304_v10 = vsub.f32 1.0, %v288_v56  ;;  %v305_v11 = vsub.f32 1.0, %v289_v57  ;;  %v306_v12 = vsub.f32 1.0, %v290_v58  ;;  %v307_v13 = vsub.f32 1.0, %v291_v60 }
  0x63   : > { %v308_v14 = vsub.f32 1.0, %v292_v61  ;;  %v309_v15 = vsub.f32 1.0, %v293_v62  ;;  %v310_v16 = vsub.f32 1.0, %v294_v63  ;;  %v311_v17 = vsub.f32 1.0, %v295_v0 }
  0x64   : > { %v312_v18 = vsub.f32 1.0, %v296_v1  ;;  %v313_v19 = vsub.f32 1.0, %v297_v3  ;;  %v314_v20 = vsub.f32 1.0, %v298_v4  ;;  %v315_v21 = vsub.f32 1.0, %v299_v5 }
  0x65   : > { %v316_v22 = vsub.f32 1.0, %v300_v6  ;;  %v317_v24 = vsub.f32 1.0, %v301_v7  ;;  %v318_v25 = vsub.f32 1.0, %v302_v8  ;;  %v319_v26 = vsub.f32 1.0, %v303_v9 }
  0x66   : > { %v320_v27 = vmax.f32 %v304_v10, 0.0  ;;  %v321_v28 = vmax.f32 %v305_v11, 0.0  ;;  %v322_v29 = vmax.f32 %v306_v12, 0.0  ;;  %v323_v30 = vmax.f32 %v307_v13, 0.0 }
  0x67   : > { %v324_v31 = vmax.f32 %v308_v14, 0.0  ;;  %v325_v32 = vmax.f32 %v309_v15, 0.0  ;;  %v326_v33 = vmax.f32 %v310_v16, 0.0  ;;  %v327_v34 = vmax.f32 %v311_v17, 0.0  ;;  %730 = sbr.rel (%p729_p13) target bundleno = 365 (0x16d), region = 88 }
  0x68   : > { %v328_v35 = vmax.f32 %v312_v18, 0.0  ;;  %v329_v36 = vmax.f32 %v313_v19, 0.0  ;;  %v330_v37 = vmax.f32 %v314_v20, 0.0  ;;  %v331_v38 = vmax.f32 %v315_v21, 0.0 }
  0x69   : > { %v332_v39 = vmax.f32 %v316_v22, 0.0  ;;  %v333_v40 = vmax.f32 %v317_v24, 0.0  ;;  %v334_v41 = vmax.f32 %v318_v25, 0.0  ;;  %v335_v42 = vmax.f32 %v319_v26, 0.0 }
  0x6a   : > { %v1336_v43 = vpack.c.bf16 %v321_v28, %v320_v27  ;;  %v1338_v44 = vpack.c.bf16 %v323_v30, %v322_v29  ;;  %v1340_v45 = vpack.c.bf16 %v325_v32, %v324_v31  ;;  %v1342_v46 = vpack.c.bf16 %v327_v34, %v326_v33 }
  0x6b   : > { %v1344_v47 = vpack.c.bf16 %v329_v36, %v328_v35  ;;  %v1346_v48 = vpack.c.bf16 %v331_v38, %v330_v37  ;;  %v1348_v49 = vpack.c.bf16 %v333_v40, %v332_v39  ;;  %v1350_v50 = vpack.c.bf16 %v335_v42, %v334_v41 }
  0x6c LB: >> { %s805_s22 = sshll.u32 %s1132_s15, 6  ;;  %s798_s18 = sshll.u32 %s1132_s15, 3  ;;  %v527_v24 = vsub.s32 1, %v1313_v2  ;;  %s1132_s15 = sphi %s1304_s15, %s350_s15  }
  0x6d   : >> { %823 = vmatprep.subr.bf16.mxu0 %v1350_v50  ;;  %855 = vmatprep.subr.bf16.mxu1 %v1350_v50  ;;  %s1369_s16 = scalar_lea.vmem %s1296_s13, %s805_s22 [#allocation8]  ;;  %s518_s20 = scvt.s32.f32 %s798_s18 }
  0x6e   : >> { %824 = vmatpush3.bf16.msra.mxu0 %v1350_v50  ;;  %863 = vmatpush3.bf16.msra.mxu1 %v1350_v50  ;;  %v954_v51 = vld [vmem:[%s1369_s16] sm:$0xff]   ;;  %v955_v53 = vld [vmem:[%s1369_s16 + $0x8] sm:$0xff]   ;;  %v958_v55 = vld [vmem:[%s1369_s16 + $0x10] sm:$0xff]   ;;  %s350_s15 = sadd.s32 1, %s1132_s15  }
  0x6f   : >> { %825 = vmatprep.subr.bf16.mxu0 %v1348_v49  ;;  %856 = vmatprep.subr.bf16.mxu1 %v1348_v49  ;;  %v956_v52 = vld [vmem:[%s1369_s16 + $0x20] sm:$0xff]   ;;  %v957_v54 = vld [vmem:[%s1369_s16 + $0x28] sm:$0xff]   ;;  %v960_v56 = vld [vmem:[%s1369_s16 + $0x30] sm:$0xff]   ;;  %s531_s27 = sadd.f32 1.0, %s518_s20  ;;  %v520_v59 = vstv %s518_s20  ;;  %p349_p5 = scmp.ge.s32.totalorder %s350_s15, %s346_s7 }
  0x70   : >> { %839 = vmatprep.mubr.bf16.mxu0 %v954_v51  ;;  %847 = vmatprep.mubr.bf16.mxu1 %v956_v52  ;;  %v959_v57 = vld [vmem:[%s1369_s16 + $0x18] sm:$0xff]   ;;  %s545_s28 = sadd.f32 2.0, %s518_s20  ;;  %v521_v61 = vsub.f32 %v520_v59, %v1332_v23 }
  0x71   : >> { %v961_v58 = vld [vmem:[%s1369_s16 + $0x38] sm:$0xff]   ;;  %v532_v60 = vstv %s531_s27  ;;  %s559_s5 = sadd.f32 3.0, %s518_s20 }
  0x72   : >> { %826 = vmatpush3.bf16.msra.mxu0 %v1348_v49  ;;  %864 = vmatpush3.bf16.msra.mxu1 %v1348_v49  ;;  %s573_s6 = sadd.f32 4.0, %s518_s20  ;;  %v546_v62 = vstv %s545_s28  ;;  %v533_v63 = vsub.f32 %v532_v60, %v1332_v23  ;;  %v522_v1 = vand.u32 2147483647, %v521_v61 }
  0x73   : >> { %827 = vmatprep.subr.bf16.mxu0 %v1346_v48  ;;  %857 = vmatprep.subr.bf16.mxu1 %v1346_v48  ;;  %s587_s12 = sadd.f32 5.0, %s518_s20  ;;  %v560_v0 = vstv %s559_s5  ;;  %v547_v3 = vsub.f32 %v546_v62, %v1332_v23 }
  0x74   : >> { %s601_s19 = sadd.f32 6.0, %s518_s20  ;;  %v574_v4 = vstv %s573_s6  ;;  %v534_v5 = vand.u32 2147483647, %v533_v63  ;;  %v561_v6 = vsub.f32 %v560_v0, %v1332_v23  ;;  %v523_v8 = vsub.f32 1.0, %v522_v1 }
  0x75   : >> { %s615_s30 = sadd.f32 7.0, %s518_s20  ;;  %v588_v7 = vstv %s587_s12  ;;  %v575_v9 = vsub.f32 %v574_v4, %v1332_v23  ;;  %v548_v10 = vand.u32 2147483647, %v547_v3 }
  0x76   : >> { %828 = vmatpush3.bf16.msra.mxu0 %v1346_v48  ;;  %865 = vmatpush3.bf16.msra.mxu1 %v1346_v48  ;;  %v602_v11 = vstv %s601_s19  ;;  %v535_v12 = vsub.f32 1.0, %v534_v5  ;;  %v589_v13 = vsub.f32 %v588_v7, %v1332_v23  ;;  %v562_v14 = vand.u32 2147483647, %v561_v6 }
  0x77   : >> { %829 = vmatprep.subr.bf16.mxu0 %v1344_v47  ;;  %858 = vmatprep.subr.bf16.mxu1 %v1344_v47  ;;  %v616_v15 = vstv %s615_s30  ;;  %v603_v16 = vsub.f32 %v602_v11, %v1332_v23  ;;  %v524_v17 = vmax.f32 %v523_v8, 0.0  ;;  %v576_v18 = vand.u32 2147483647, %v575_v9 }
  0x78   : >> { %v549_v19 = vsub.f32 1.0, %v548_v10  ;;  %v617_v22 = vsub.f32 %v616_v15, %v1332_v23  ;;  %v536_v25 = vmax.f32 %v535_v12, 0.0  ;;  %v590_v26 = vand.u32 2147483647, %v589_v13 }
  0x79   : >> { %v563_v27 = vsub.f32 1.0, %v562_v14  ;;  %v604_v30 = vand.u32 2147483647, %v603_v16  ;;  %v528_v31 = vrot.slane %v524_v17, %v527_v24  ;;  %v577_v32 = vsub.f32 1.0, %v576_v18 }
  0x7a   : >> { %830 = vmatpush3.bf16.msra.mxu0 %v1344_v47  ;;  %866 = vmatpush3.bf16.msra.mxu1 %v1344_v47  ;;  %v550_v33 = vmax.f32 %v549_v19, 0.0  ;;  %v618_v36 = vand.u32 2147483647, %v617_v22  ;;  %v540_v37 = vrot.slane %v536_v25, %v527_v24  ;;  %v591_v38 = vsub.f32 1.0, %v590_v26 }
  0x7b   : >> { %831 = vmatprep.subr.bf16.mxu0 %v1342_v46  ;;  %859 = vmatprep.subr.bf16.mxu1 %v1342_v46  ;;  %v564_v39 = vmax.f32 %v563_v27, 0.0  ;;  %v605_v42 = vsub.f32 1.0, %v604_v30  ;;  %v578_v52 = vmax.f32 %v577_v32, 0.0 }
  0x7d   : >> { %v568_v59 = vrot.slane %v564_v39, %v527_v24  ;;  %v606_v61 = vmax.f32 %v605_v42, 0.0  ;;  %v582_v63 = vrot.slane %v578_v52, %v527_v24 }
  0x7e   : >> { %832 = vmatpush3.bf16.msra.mxu0 %v1342_v46  ;;  %867 = vmatpush3.bf16.msra.mxu1 %v1342_v46 }
  0x7f   : >> { %833 = vmatprep.subr.bf16.mxu0 %v1340_v45  ;;  %860 = vmatprep.subr.bf16.mxu1 %v1340_v45  ;;  %v610_v10 = vrot.slane %v606_v61, %v527_v24 }
  0x82   : >> { %834 = vmatpush3.bf16.msra.mxu0 %v1340_v45  ;;  %868 = vmatpush3.bf16.msra.mxu1 %v1340_v45 }
  0x83   : >> { %835 = vmatprep.subr.bf16.mxu0 %v1338_v44  ;;  %861 = vmatprep.subr.bf16.mxu1 %v1338_v44 }
  0x86   : >> { %836 = vmatpush3.bf16.msra.mxu0 %v1338_v44  ;;  %869 = vmatpush3.bf16.msra.mxu1 %v1338_v44 }
  0x87   : >> { %837 = vmatprep.subr.bf16.mxu0 %v1336_v43  ;;  %862 = vmatprep.subr.bf16.mxu1 %v1336_v43 }
  0x8a   : >> { %838 = vmatpush3.bf16.msra.mxu0 %v1336_v43  ;;  %870 = vmatpush3.bf16.msra.mxu1 %v1336_v43 }
  0x8d   : >> { %840 = vmatmul.mubr.bf16.vlgmr.msra.gmra.mxu0 %v955_v53  ;;  %848 = vmatmul.mubr.bf16.vlgmr.msra.gmra.mxu1 %v957_v54  ;;  %v554_v53 = vrot.slane %v550_v33, %v527_v24 }
  0x8e   : >> { %843 = vmatprep.mubr.bf16.mxu0 %v958_v55  ;;  %851 = vmatprep.mubr.bf16.mxu1 %v960_v56  ;;  %v619_v56 = vsub.f32 1.0, %v618_v36 }
  0x90   : >> { %v620_v3 = vmax.f32 %v619_v56, 0.0 }
  0x92   : >> { %v624_v16 = vrot.slane %v620_v3, %v527_v24 }
  0x95   : >> { %844 = vmatmul.mubr.bf16.gmra.mxu0 %v959_v57  ;;  %852 = vmatmul.mubr.bf16.gmra.mxu1 %v961_v58  ;;  %v592_v58 = vmax.f32 %v591_v38, 0.0 }
  0x97   : >> { %v596_v6 = vrot.slane %v592_v58, %v527_v24 }
 0x14d   : >> { %v841_v20 = vpop.f32.mrf.mxu0  ;;  %v849_v21 = vpop.f32.mrf.mxu1 }
 0x14e   : >> { %v541_v57 = vmul.f32 %v841_v20, %v540_v37  ;;  %v597_v18 = vmul.f32 %v849_v21, %v596_v6 }
 0x14f   : >> { %v454_v28 = vpop.f32.mrf.mxu0  ;;  %v486_v29 = vpop.f32.mrf.mxu1 }
 0x150   : >> { %v529_v51 = vmul.f32 %v528_v31, %v454_v28  ;;  %v583_v12 = vmul.f32 %v582_v63, %v486_v29 }
 0x151   : >> { %v842_v34 = vpop.f32.mrf.mxu0  ;;  %v850_v35 = vpop.f32.mrf.mxu1 }
 0x152   : >> { %v543_v62 = vadd.f32 %v541_v57, %v529_v51  ;;  %v542_v7 = vmul.f32 %v842_v34, %v540_v37  ;;  %v629_v34 = vld [vmem:[%s1309_s21] sm:$0xff] }
 0x153   : >> { %v457_v40 = vpop.f32.mrf.mxu0  ;;  %v489_v41 = vpop.f32.mrf.mxu1 }
 0x154   : >> { %v530_v0 = vmul.f32 %v528_v31, %v457_v40  ;;  %v584_v25 = vmul.f32 %v582_v63, %v489_v41  ;;  %v598_v31 = vmul.f32 %v850_v35, %v596_v6  ;;  %v630_v40 = vld [vmem:[%s1309_s21 + $0x8] sm:$0xff] }
 0x155   : >> { %v845_v54 = vpop.f32.mrf.mxu0  ;;  %v853_v55 = vpop.f32.mrf.mxu1 }
 0x156   : >> { %v569_v8 = vmul.f32 %v845_v54, %v568_v59  ;;  %v544_v13 = vadd.f32 %v542_v7, %v530_v0  ;;  %v625_v29 = vmul.f32 %v853_v55, %v624_v16 }
 0x157   : >> { %v470_v60 = vpop.f32.mrf.mxu0  ;;  %v502_v5 = vpop.f32.mrf.mxu1 }
 0x158   : >> { %v555_v1 = vmul.f32 %v554_v53, %v470_v60  ;;  %v611_v27 = vmul.f32 %v610_v10, %v502_v5 }
 0x159   : >> { %v846_v4 = vpop.f32.mrf.mxu0  ;;  %v854_v17 = vpop.f32.mrf.mxu1 }
 0x15a   : >> { %v557_v9 = vadd.f32 %v555_v1, %v543_v62  ;;  %v570_v19 = vmul.f32 %v846_v4, %v568_v59  ;;  %v626_v38 = vmul.f32 %v854_v17, %v624_v16 }
 0x15b   : >> { %v473_v11 = vpop.f32.mrf.mxu0  ;;  %v505_v30 = vpop.f32.mrf.mxu1 }
 0x15c   : >> { %v571_v14 = vadd.f32 %v569_v8, %v557_v9  ;;  %v556_v15 = vmul.f32 %v554_v53, %v473_v11  ;;  %v612_v37 = vmul.f32 %v610_v10, %v505_v30 }
 0x15e   : >> { %v585_v20 = vadd.f32 %v583_v12, %v571_v14  ;;  %v558_v22 = vadd.f32 %v556_v15, %v544_v13 }
 0x160   : >> { %v599_v26 = vadd.f32 %v597_v18, %v585_v20  ;;  %v572_v28 = vadd.f32 %v570_v19, %v558_v22 }
 0x162   : >> { %v613_v32 = vadd.f32 %v611_v27, %v599_v26  ;;  %v586_v33 = vadd.f32 %v584_v25, %v572_v28 }
 0x164   : >> { %v627_v36 = vadd.f32 %v625_v29, %v613_v32  ;;  %v600_v24 = vadd.f32 %v598_v31, %v586_v33 }
 0x166   : >> { %v631_v21 = vadd.f32 %v629_v34, %v627_v36  ;;  %v614_v39 = vadd.f32 %v612_v37, %v600_v24 }
 0x168   : >> { %633 = vst [vmem:[%s1309_s21] sm:$0xff] %v631_v21  ;;  %v628_v41 = vadd.f32 %v626_v38, %v614_v39  ;;  %352 = sbr.rel (!%p349_p5) target bundleno = 108 (0x6c), region = 94 }
 0x16a   : >> { %v632_v42 = vadd.f32 %v630_v40, %v628_v41 }
 0x16c   : >> { %634 = vst [vmem:[%s1309_s21 + $0x8] sm:$0xff] %v632_v42 }
 0x16d PF: > { %vm635_vm0 = vcmp.lt.s32.totalorder %v1313_v2, 3  ;;  %s806_s14 = sshll.u32 %s1120_s24, 8  ;;  %v1141_v51 = vmov 1.0   ;;  %s660_s15 = sshll.u32 %s1309_s21, 4  ;;  %s1433_s15 = int_to_ptr.vmem [resolvable:$true] %s660_s15 }
 0x16e   : > { %v637_v52 = vsel %vm635_vm0, 20.0, %v1141_v51  ;;  %s1430_s18 = scalar_lea.hbm %s1485_s4, %s806_s14  ;;  %s646_s13 = scalar_lea.sflag [#allocation7], %s1286_s11 }
 0x16f   : > { %v639_v35 = vld [vmem:[%s1309_s21] sm:$0xff]  ;;  %s1038_s17 = scalar_lea.vmem %s1433_s15, 256  ;;  %s1142_s24 = smov [#allocation10]  }
 0x170   : > { %v641_v53 = vmul.f32 %v639_v35, %v637_v52  ;;  %p1039_p8 = scmp.ne.s32.totalorder %s1433_s15, %s1038_s17  ;;  %s1042_s7 = sshll.u32 %s1142_s24, 4  ;;  %s1043_s7 = int_to_ptr.vmem [resolvable:$false] %s1042_s7 }
 0x171   : > { %s1044_s20 = scalar_lea.vmem %s1043_s7, 512  ;;  %p1045_p3 = scmp.lt.s32.totalorder %s1433_s15, %s1043_s7 }
 0x172   : > { %643 = vst [vmem:[%s1309_s21] sm:$0xff] %v641_v53  ;;  %p1040_p4 = pnand %p1039_p8, %p1227_p0  ;;  %p1046_p11 = scmp.lt.s32.totalorder %s1044_s20, %s1038_s17 }
 0x174   : > { %p1041_p10 = pneg %p1040_p4  ;;  %p1047_p12 = por %p1046_p11, %p1045_p3 }
 0x176   : > { %p1048_p6 = pnand %p1047_p12, %p1041_p10 }
 0x178   : > { %1051 = shalt.err (!%p1048_p6)
}
 0x179   : > { %s1052_s21 = scalar_lea.hbm %s1430_s18, 256  ;;  %s1056_s5 = scalar_lea.hbm %s1485_s4, 512 }
 0x17a   : > { %p1053_p7 = scmp.ne.s32.totalorder %s1430_s18, %s1052_s21  ;;  %p1057_p13 = scmp.lt.s32.totalorder %s1430_s18, %s1485_s4 }
 0x17b   : > { %p1058_p5 = scmp.lt.s32.totalorder %s1056_s5, %s1052_s21 }
 0x17c   : > { %p1054_p9 = pnand %p1053_p7, %p1227_p0 }
 0x17d   : > { %p1059_p8 = por %p1058_p5, %p1057_p13 }
 0x17e   : > { %p1055_p1 = pneg %p1054_p9 }
 0x180   : > { %p1060_p4 = pnand %p1059_p8, %p1055_p1 }
 0x182   : > { %1063 = shalt.err (!%p1060_p4)
}
 0x183   : > { %s1143_s19 = smov 128   ;;  %s1144_s30 = smov 8  }
 0x184   : > { %875 = dma.vmem_to_hbm [thread:$0]  (%p1227_p0), %s1433_s15, 256, %s1430_s18, %s646_s13, %s1143_s19, %s1143_s19, %s1144_s30  }
 0x185 PF: > { %s675_s14 = sand.u32 1, %s1108_s0   ;;  %p1493_p10 = scmp.ge.s32.totalorder %s1128_s26, 2 }
 0x186   : > { %s676_s22 = scalar_lea.sflag [#allocation7], %s675_s14 }
 0x187   : > { %p885_p3 = pnand %p1493_p10, %p1234_p2 }
 0x189   : > { %p886_p11 = pneg %p885_p3 }
 0x18b   : > { %1103 = dma.done.wait (%p886_p11), %s676_s22, 256  }
 0x18c   : > { %1105 = vsyncadd (%p886_p11), %s676_s22, 4294967040  ;;  %s31_s26 = sadd.s32 1, %s1128_s26   ;;  %s1494_s0 = smov %s1112_s1 }
 0x18d   : > { %p28_p12 = scmp.ge.s32.totalorder %s31_s26, 4   ;;  %s1495_s1 = smov %s1116_s23 }
 0x18e   : > { %s1496_s23 = smov %s1232_s9  ;;  %s1497_s24 = smov %s1124_s25 }
 0x18f   : > { %s1498_s25 = smov %s1500_s29  ;;  %30 = sbr.rel (!%p28_p12) target bundleno = 24 (0x18), region = 105 }
 0x194   :  { %681 = vsyncpa [#allocation6], 1 }
 0x195   :  { %683 = vsyncpa [#allocation6 + $0x1], 1 }
 0x196   :  { %684 = vsyncpa [#allocation9], 1 }
 0x197   :  { %686 = vsyncpa [#allocation9 + $0x1], 1 }
 0x198   :  { %687 = vsyncpa [#allocation7], 1 }
 0x199   :  { %689 = vsyncpa [#allocation7 + $0x1], 1 }

</bundles_post_ra>
